<compile_context>
chip_gen: v6e
topology: v6e:2x2x1
jax: 0.10.0
libtpu: 0.0.40
codegen_flags: <defaults>
</compile_context>

<pallas_src>
import jax
import jax.numpy as jnp
from jax.experimental import pallas as pl
from jax.experimental.pallas import tpu as pltpu


def _rnn_cell_kernel(x_ref, h_ref, wih_ref, whh_ref, b_ref, out_ref):
    # Hot path: two MXU matmuls (bf16 in, f32 acc) + VPU bias add + EUP tanh,
    # all on one VMEM-resident [TB, Dh] tile.
    acc = jnp.dot(x_ref[...], wih_ref[...], preferred_element_type=jnp.float32)
    acc = acc + jnp.dot(h_ref[...], whh_ref[...], preferred_element_type=jnp.float32)
    acc = acc + b_ref[...]                      # [1, Dh] broadcasts over the batch tile
    out_ref[...] = jnp.tanh(acc).astype(out_ref.dtype)


def _round_up(x, m):
    return ((x + m - 1) // m) * m


def prepare_rnn_params(w_ih, w_hh, b_ih, b_hh, compute_dtype=jnp.bfloat16):
    """One-time parameter prep (hoisted out of the per-step hot path).

    Transposes weights to [in, out] layout for plain x @ W on the MXU, casts
    them to the MXU-native compute dtype, and folds both biases into a single
    f32 row (exact: addition is associative in f32 here).
    """
    w_ih_t = jnp.transpose(w_ih).astype(compute_dtype)        # [Dm, Dh]
    w_hh_t = jnp.transpose(w_hh).astype(compute_dtype)        # [Dh, Dh]
    bias = (b_ih.astype(jnp.float32) + b_hh.astype(jnp.float32)).reshape(1, -1)
    return w_ih_t, w_hh_t, bias


def rnn_memory_update(messages, memory, params, *, block_b=256):
    """messages: [B, Dm], memory: [B, Dh]; params from prepare_rnn_params."""
    w_ih_t, w_hh_t, bias = params
    B, Dm = messages.shape
    Dh = memory.shape[1]
    compute_dtype = w_ih_t.dtype
    out_dtype = memory.dtype

    # Batch tile: fill MXU rows (256 on v6e/v7x), but never exceed (padded) B.
    tb = min(block_b, _round_up(B, 8))
    Bp = _round_up(B, tb)

    x = messages.astype(compute_dtype)
    h = memory.astype(compute_dtype)
    if Bp != B:
        pad = ((0, Bp - B), (0, 0))
        x = jnp.pad(x, pad)
        h = jnp.pad(h, pad)

    # VMEM budget: 2x (double-buffered) streamed tiles + resident weights/bias,
    # with headroom; capped at 48 MiB so it also fits v7x (64 MiB/TC physical).
    act_bytes = jnp.dtype(compute_dtype).itemsize
    out_bytes = jnp.dtype(out_dtype).itemsize
    streamed = tb * (Dm + Dh) * act_bytes + tb * Dh * out_bytes
    resident = (Dm * Dh + Dh * Dh) * act_bytes + Dh * 4
    vmem_limit = min(max(4 * streamed + 2 * resident + (4 << 20), 8 << 20), 48 << 20)

    grid = (pl.cdiv(Bp, tb),)
    out = pl.pallas_call(
        _rnn_cell_kernel,
        out_shape=jax.ShapeDtypeStruct((Bp, Dh), out_dtype),
        grid=grid,
        in_specs=[
            pl.BlockSpec((tb, Dm), lambda i: (i, 0)),   # x tile: streams over batch
            pl.BlockSpec((tb, Dh), lambda i: (i, 0)),   # h tile: streams over batch
            pl.BlockSpec((Dm, Dh), lambda i: (0, 0)),   # W_ih^T: VMEM-resident
            pl.BlockSpec((Dh, Dh), lambda i: (0, 0)),   # W_hh^T: VMEM-resident
            pl.BlockSpec((1, Dh), lambda i: (0, 0)),    # fused bias row: resident
        ],
        out_specs=pl.BlockSpec((tb, Dh), lambda i: (i, 0)),
        compiler_params=pltpu.CompilerParams(
            dimension_semantics=("parallel",),          # megacore sharding on v7x
            vmem_limit_bytes=int(vmem_limit),
        ),
    )(x, h, w_ih_t, w_hh_t, bias)

    return out[:B] if Bp != B else out


def rnn_memory_update_ref(messages, memory, w_ih, w_hh, b_ih, b_hh):
    """Pure-JAX f32 reference matching torch.nn.RNNCell forward."""
    return jnp.tanh(messages @ w_ih.T + b_ih + memory @ w_hh.T + b_hh)


if __name__ == "__main__":
    # Shapes sized to exercise the batch grid (2 tiles of TB=256) while staying small.
    B = 512
    MESSAGE_DIM = 128
    MEMORY_DIM = 128

    key = jax.random.PRNGKey(0)
    k_msg, k_mem, k_wih, k_whh, k_bih, k_bhh = jax.random.split(key, 6)

    messages = jax.random.normal(k_msg, (B, MESSAGE_DIM), dtype=jnp.float32)
    memory = jax.random.normal(k_mem, (B, MEMORY_DIM), dtype=jnp.float32)

    # Parameter init matching nn.RNNCell's U(-1/sqrt(H), 1/sqrt(H)).
    bound = 1.0 / (MEMORY_DIM ** 0.5)
    w_ih = jax.random.uniform(k_wih, (MEMORY_DIM, MESSAGE_DIM), jnp.float32, -bound, bound)
    w_hh = jax.random.uniform(k_whh, (MEMORY_DIM, MEMORY_DIM), jnp.float32, -bound, bound)
    b_ih = jax.random.uniform(k_bih, (MEMORY_DIM,), jnp.float32, -bound, bound)
    b_hh = jax.random.uniform(k_bhh, (MEMORY_DIM,), jnp.float32, -bound, bound)

    # One-time prep (per parameter update), outside the hot path.
    params = prepare_rnn_params(w_ih, w_hh, b_ih, b_hh, compute_dtype=jnp.bfloat16)

    out = rnn_memory_update(messages, memory, params, block_b=256)
    out = jax.block_until_ready(out)

    ref = rnn_memory_update_ref(messages, memory, w_ih, w_hh, b_ih, b_hh)
    assert out.shape == (B, MEMORY_DIM)
    # bf16 inputs / f32 accumulation -> loosened tolerance vs the f32 reference.
    assert jnp.allclose(out, ref, atol=2e-2, rtol=2e-2), (
        float(jnp.max(jnp.abs(out - ref))))

    print("KERNEL_OK")
</pallas_src>

<mosaic_0001>
module attributes {stable_mosaic.version = 11 : i64} {
  func.func @_rnn_cell_kernel(%arg0: i32, %arg1: memref<256x128xbf16, #tpu.memory_space<vmem>>, %arg2: memref<256x128xbf16, #tpu.memory_space<vmem>>, %arg3: memref<128x128xbf16, #tpu.memory_space<vmem>>, %arg4: memref<128x128xbf16, #tpu.memory_space<vmem>>, %arg5: memref<1x128xf32, #tpu.memory_space<vmem>>, %arg6: memref<256x128xf32, #tpu.memory_space<vmem>>) attributes {dimension_semantics = [#tpu.dimension_semantics<parallel>], iteration_bounds = array<i64: 2>, scalar_prefetch = 0 : i64, scratch_operands = 0 : i64, tpu.core_type = #tpu.core_type<tc>, window_params = [{transform_indices = @transform_0, window_bounds = array<i64: 256, 128>}, {transform_indices = @transform_1, window_bounds = array<i64: 256, 128>}, {pipeline_mode = #tpu.pipeline_mode<synchronous>, transform_indices = @transform_2, window_bounds = array<i64: 128, 128>}, {pipeline_mode = #tpu.pipeline_mode<synchronous>, transform_indices = @transform_3, window_bounds = array<i64: 128, 128>}, {pipeline_mode = #tpu.pipeline_mode<synchronous>, transform_indices = @transform_4, window_bounds = array<i64: 1, 128>}, {transform_indices = @transform_5, window_bounds = array<i64: 256, 128>}]} {
    %c0 = arith.constant 0 : index
    %c0_0 = arith.constant 0 : index
    %0 = vector.load %arg1[%c0, %c0_0] : memref<256x128xbf16, #tpu.memory_space<vmem>>, vector<256x128xbf16>
    %c0_1 = arith.constant 0 : index
    %c0_2 = arith.constant 0 : index
    %1 = vector.load %arg3[%c0_1, %c0_2] : memref<128x128xbf16, #tpu.memory_space<vmem>>, vector<128x128xbf16>
    %cst = arith.constant dense<0.000000e+00> : vector<256x128xf32>
    %2 = tpu.matmul %0, %1, %cst {dimension_numbers = #tpu.dot_dimension_numbers<[1], [0], [0], [1], [0, 0, 1, 1], [], []>} : vector<256x128xbf16>, vector<128x128xbf16>, vector<256x128xf32> -> vector<256x128xf32>
    %c0_3 = arith.constant 0 : index
    %c0_4 = arith.constant 0 : index
    %3 = vector.load %arg2[%c0_3, %c0_4] : memref<256x128xbf16, #tpu.memory_space<vmem>>, vector<256x128xbf16>
    %c0_5 = arith.constant 0 : index
    %c0_6 = arith.constant 0 : index
    %4 = vector.load %arg4[%c0_5, %c0_6] : memref<128x128xbf16, #tpu.memory_space<vmem>>, vector<128x128xbf16>
    %cst_7 = arith.constant dense<0.000000e+00> : vector<256x128xf32>
    %5 = tpu.matmul %3, %4, %cst_7 {dimension_numbers = #tpu.dot_dimension_numbers<[1], [0], [0], [1], [0, 0, 1, 1], [], []>} : vector<256x128xbf16>, vector<128x128xbf16>, vector<256x128xf32> -> vector<256x128xf32>
    %6 = arith.addf %2, %5 : vector<256x128xf32>
    %c0_8 = arith.constant 0 : index
    %c0_9 = arith.constant 0 : index
    %7 = vector.load %arg5[%c0_8, %c0_9] : memref<1x128xf32, #tpu.memory_space<vmem>>, vector<1x128xf32>
    %8 = vector.broadcast %7 : vector<1x128xf32> to vector<256x128xf32>
    %9 = arith.addf %6, %8 : vector<256x128xf32>
    %10 = math.tanh %9 : vector<256x128xf32>
    %c0_10 = arith.constant 0 : index
    %c0_11 = arith.constant 0 : index
    %11 = vector.load %arg6[%c0_10, %c0_11] : memref<256x128xf32, #tpu.memory_space<vmem>>, vector<256x128xf32>
    tpu.vector_store %arg6[%c0_10, %c0_11], %10 {strides = array<i32>} : memref<256x128xf32, #tpu.memory_space<vmem>>, vector<256x128xf32>,
    return
  }
  func.func @transform_0(%arg0: i32) -> (i32, i32) {
    %c0_i32 = arith.constant 0 : i32
    %c0_i32_0 = arith.constant 0 : i32
    return %arg0, %c0_i32 : i32, i32
  }
  func.func @transform_1(%arg0: i32) -> (i32, i32) {
    %c0_i32 = arith.constant 0 : i32
    %c0_i32_0 = arith.constant 0 : i32
    return %arg0, %c0_i32 : i32, i32
  }
  func.func @transform_2(%arg0: i32) -> (i32, i32) {
    %c0_i32 = arith.constant 0 : i32
    %c0_i32_0 = arith.constant 0 : i32
    %c0_i32_1 = arith.constant 0 : i32
    return %c0_i32, %c0_i32_0 : i32, i32
  }
  func.func @transform_3(%arg0: i32) -> (i32, i32) {
    %c0_i32 = arith.constant 0 : i32
    %c0_i32_0 = arith.constant 0 : i32
    %c0_i32_1 = arith.constant 0 : i32
    return %c0_i32, %c0_i32_0 : i32, i32
  }
  func.func @transform_4(%arg0: i32) -> (i32, i32) {
    %c0_i32 = arith.constant 0 : i32
    %c0_i32_0 = arith.constant 0 : i32
    %c0_i32_1 = arith.constant 0 : i32
    return %c0_i32, %c0_i32_0 : i32, i32
  }
  func.func @transform_5(%arg0: i32) -> (i32, i32) {
    %c0_i32 = arith.constant 0 : i32
    %c0_i32_0 = arith.constant 0 : i32
    return %arg0, %c0_i32 : i32, i32
  }
}

</mosaic_0001>

<bundles_post_ra>
// kernel: tpu_custom_call.1
= control target key start
LH: loop header
LB: loop body
LE: loop exit
PB: predicated region body
PF: predicated region fallthrough
CT: control target
= control target key end

     0   :  { %s2242_s0 = inlined_call_operand.hbm [shape: bf16[512,128], index: 0, kind: input, shape index: {}]   ;;  %s2243_s1 = inlined_call_operand.hbm [shape: bf16[512,128], index: 1, kind: input, shape index: {}]   ;;  %s2244_s2 = inlined_call_operand.hbm [shape: bf16[128,128], index: 2, kind: input, shape index: {}]   ;;  %s2245_s3 = inlined_call_operand.hbm [shape: bf16[128,128], index: 3, kind: input, shape index: {}]   ;;  %s2246_s4 = inlined_call_operand.vmem [shape: f32[1,128], index: 4, kind: input, shape index: {}]   ;;  %s2247_s5 = inlined_call_operand.hbm [shape: f32[512,128], index: 5, kind: output, shape index: {}]  }
   0x1   :  { %2255 = sst [smem:[#allocation16_spill]] %s2242_s0 }
   0x2   :  { %2256 = sst [smem:[#allocation17_spill]] %s2244_s2 }
   0x3   :  { %10 = vsyncpa [#allocation3], 0 }
   0x4   :  { %12 = vsyncpa [#allocation3 + $0x1], 0 }
   0x5   :  { %13 = vsyncpa [#allocation6], 0 }
   0x6   :  { %15 = vsyncpa [#allocation6 + $0x1], 0 }
   0x7   :  { %16 = vsyncpa [#allocation9], 0 }
   0x8   :  { %17 = vsyncpa [#allocation4], 0 }
   0x9   :  { %19 = vsyncpa [#allocation4 + $0x1], 0  ;;  %s1885_s18 = smov 0   ;;  %s1887_s19 = smov 0  }
   0xa   :  { %s1889_s20 = smov 0   ;;  %s1891_s21 = smov 0  }
   0xb LB: > { %s1906_s22 = sadd.s32 4294967295, %s1844_s21   ;;  %s1254_s23 = sadd.s32 4294967294, %s1844_s21   ;;  %s1844_s21 = sphi %s1891_s21, %s2278_s21   ;;  %s1840_s20 = sphi %s1889_s20, %s2277_s20   ;;  %s1836_s19 = sphi %s1887_s19, %s2276_s19   ;;  %s1832_s18 = sphi %s1885_s18, %s2275_s18  }
   0xc   : > { %p45_p0 = scmp.ne.s32.totalorder %s1836_s19, %s1832_s18  ;;  %p2252_p1 = scmp.eq.s32.totalorder %s1906_s22, 0 }
   0xd   : > { %p158_p2 = scmp.eq.s32.totalorder %s1906_s22, 1  ;;  %p164_p3 = scmp.eq.s32.totalorder %s1254_s23, 1 }
   0xe   : > { %p1915_p4 = por %p2252_p1, %p45_p0  ;;  %p1255_p5 = scmp.ge.s32.totalorder %s1844_s21, 1 }
   0xf   : > { %p1920_p6 = por %p164_p3, %p45_p0  ;;  %p171_p7 = scmp.lt.s32.totalorder %s1844_s21, 3 }
  0x10   : > { %s2257_s24 = scalar_select %p1915_p4, 1, 0 }
  0x11   : > { %s2258_s25 = scalar_select %p1920_p6, 1, 0 }
  0x12   : > { %p1925_p8 = pnand %p1255_p5, %p171_p7  ;;  %s1846_s27 = smov [#allocation7]  }
  0x13   : > { %s183_s28 = sshll.u32 %s1846_s27, 4  ;;  %s1847_s30 = smov [#allocation8]   ;;  %s184_s28 = int_to_ptr.vmem [resolvable:$true] %s183_s28 }
  0x14   : > { %p1486_p9 = pneg %p1925_p8  ;;  %s196_s6 = sshll.u32 %s1847_s30, 4  ;;  %s197_s6 = int_to_ptr.vmem [resolvable:$true] %s196_s6 }
  0x15   : > { %s1671_s7 = scalar_lea.vmem %s184_s28, 1024  ;;  %p1679_p5 = scmp.lt.s32.totalorder %s184_s28, %s184_s28 }
  0x16   : > { %p1934_p11 = pnand %p1486_p9, %p2252_p1  ;;  %p1672_p13 = scmp.ne.s32.totalorder %s184_s28, %s1671_s7 }
  0x17   : > { %p1680_p7 = scmp.lt.s32.totalorder %s1671_s7, %s1671_s7 }
  0x18   : > { %p1662_p12 = pneg %p1934_p11 }
  0x19   : > { %p1681_p10 = por %p1680_p7, %p1679_p5 }
  0x1a   : > { %p1674_p0 = pnand %p1672_p13, %p1662_p12 }
  0x1c   : > { %p1675_p3 = pneg %p1674_p0 }
  0x1e   : > { %p1682_p9 = pnand %p1681_p10, %p1675_p3 }
  0x20   : > { %1685 = shalt.err (!%p1682_p9)
}
  0x21   : > { %s2248_s8 = smov 64   ;;  %s2250_s9 = smov 4  }
  0x22   : > { %s2261_s2 = sld [smem:[#allocation17_spill]]  ;;  %s1697_s12 = scalar_lea.vmem %s197_s6, 1024 }
  0x23   : > { %p1698_p13 = scmp.ne.s32.totalorder %s197_s6, %s1697_s12  ;;  %p1705_p10 = scmp.lt.s32.totalorder %s197_s6, %s197_s6 }
  0x24   : > { %p1706_p3 = scmp.lt.s32.totalorder %s1697_s12, %s1697_s12 }
  0x25   : > { %p1700_p0 = pnand %p1698_p13, %p1662_p12 }
  0x26   : > { %p1707_p7 = por %p1706_p3, %p1705_p10 }
  0x27   : > { %p1701_p5 = pneg %p1700_p0 }
  0x28   : > { %1489 = dma.hbm_to_vmem [thread:$0]  (!%p1934_p11), %s2261_s2, 1024, %s184_s28, [#allocation6], %s2248_s8, %s2248_s8, %s2250_s9  }
  0x29   : > { %p1708_p9 = pnand %p1707_p7, %p1701_p5 }
  0x2b   : > { %1711 = shalt.err (!%p1708_p9)
}
  0x2c   : > { %1492 = dma.hbm_to_vmem [thread:$0]  (!%p1934_p11), %s2245_s3, 1024, %s197_s6, [#allocation9], %s2248_s8, %s2248_s8, %s2250_s9  }
  0x2d   : > { %s1963_s15 = sadd.s32 1, %s1844_s21   ;;  %s32_s16 = sadd.s32 1, %s1840_s20 }
  0x2e   : > { %s29_s17 = ssub.s32 %s1844_s21, %s1963_s15  ;;  %p39_p12 = scmp.ne.s32.totalorder %s1840_s20, %s1836_s19 }
  0x2f   : > { %p30_p13 = scmp.eq.s32.totalorder %s29_s17, 0  ;;  %p40_p0 = scmp.eq.s32.totalorder %s1844_s21, 0 }
  0x30   : > { %p1973_p5 = por %p158_p2, %p39_p12  ;;  %p1506_p10 = scmp.lt.s32.totalorder %s1844_s21, 2 }
  0x31   : > { %s1979_s27 = scalar_select %p30_p13, %s1840_s20, %s32_s16  }
  0x32   : > { %s2262_s23 = scalar_select %p1973_p5, 1, 0 }
  0x33   : > { %p41_p3 = por %p40_p0, %p39_p12  ;;  %s213_s28 = sand.u32 1, %s1840_s20  }
  0x34   : > { %s1259_s29 = sshll.u32 %s213_s28, 7  ;;  %s1325_s30 = sshll.u32 %s1844_s21, 11 }
  0x35   : > { %s2263_s0 = sld [smem:[#allocation16_spill]]  ;;  %s217_s11 = scalar_lea.vmem [#allocation2], %s1259_s29 }
  0x36   : > { %s224_s12 = sshll.u32 %s217_s11, 4  ;;  %p1990_p2 = pnand %p1506_p10, %p41_p3  ;;  %s1988_s12 = int_to_ptr.vmem [resolvable:$true] %s224_s12 }
  0x37   : > { %s1997_s17 = scalar_lea.hbm %s2243_s1, %s1325_s30  ;;  %s238_s6 = scalar_lea.vmem [#allocation5], %s1259_s29 }
  0x38   : > { %s1999_s7 = sshll.u32 %s238_s6, 4  ;;  %s2001_s8 = scalar_lea.sflag [#allocation3], %s213_s28  ;;  %s2032_s7 = int_to_ptr.vmem [resolvable:$true] %s1999_s7 }
  0x39   : > { %p1714_p7 = pneg %p1990_p2 }
  0x3b   : > { %s1986_s10 = scalar_lea.hbm %s2263_s0, %s1325_s30  ;;  %s1717_s14 = scalar_lea.hbm %s2263_s0, 4096 }
  0x3c   : > { %s1712_s9 = scalar_lea.hbm %s1986_s10, 2048  ;;  %p1718_p13 = scmp.lt.s32.totalorder %s1986_s10, %s2263_s0 }
  0x3d   : > { %p1713_p11 = scmp.ne.s32.totalorder %s1986_s10, %s1712_s9  ;;  %p1719_p0 = scmp.lt.s32.totalorder %s1717_s14, %s1712_s9 }
  0x3f   : > { %p1715_p9 = pnand %p1714_p7, %p1713_p11  ;;  %p1720_p10 = por %p1719_p0, %p1718_p13 }
  0x41   : > { %p1716_p12 = pneg %p1715_p9 }
  0x43   : > { %p1721_p3 = pnand %p1720_p10, %p1716_p12 }
  0x45   : > { %1724 = shalt.err (!%p1721_p3)
}
  0x46   : > { %s1725_s28 = scalar_lea.vmem %s1988_s12, 2048  ;;  %s1850_s2 = smov [#allocation2]  }
  0x47   : > { %p1726_p1 = scmp.ne.s32.totalorder %s1988_s12, %s1725_s28  ;;  %s1730_s29 = sshll.u32 %s1850_s2, 4  ;;  %s1731_s29 = int_to_ptr.vmem [resolvable:$false] %s1730_s29 }
  0x48   : > { %s1732_s6 = scalar_lea.vmem %s1731_s29, 4096  ;;  %p1733_p6 = scmp.lt.s32.totalorder %s1988_s12, %s1731_s29 }
  0x49   : > { %p1728_p11 = pnand %p1726_p1, %p1714_p7  ;;  %p1734_p5 = scmp.lt.s32.totalorder %s1732_s6, %s1725_s28 }
  0x4b   : > { %p1729_p9 = pneg %p1728_p11  ;;  %p1735_p4 = por %p1734_p5, %p1733_p6 }
  0x4d   : > { %p1736_p13 = pnand %p1735_p4, %p1729_p9 }
  0x4f   : > { %1739 = shalt.err (!%p1736_p13)
}
  0x50   : > { %s2265_s9 = smov 4   ;;  %s2266_s11 = smov 64  }
  0x51   : > { %1496 = dma.hbm_to_vmem [thread:$0]  (!%p1990_p2), %s1986_s10, 2048, %s1988_s12, %s2001_s8, %s2266_s11, %s2266_s11, %s2265_s9  }
  0x52   : > { %s234_s14 = sand.u32 1, %s1844_s21   ;;  %s1740_s30 = scalar_lea.hbm %s1997_s17, 2048 }
  0x53   : > { %s235_s16 = scalar_lea.sflag [#allocation6], %s234_s14  ;;  %p1741_p1 = scmp.ne.s32.totalorder %s1997_s17, %s1740_s30 }
  0x54   : > { %s1745_s29 = scalar_lea.hbm %s2243_s1, 4096  ;;  %p1746_p5 = scmp.lt.s32.totalorder %s1997_s17, %s2243_s1 }
  0x55   : > { %p1743_p4 = pnand %p1741_p1, %p1714_p7  ;;  %p1747_p12 = scmp.lt.s32.totalorder %s1745_s29, %s1740_s30 }
  0x57   : > { %p1744_p6 = pneg %p1743_p4  ;;  %p1748_p0 = por %p1747_p12, %p1746_p5 }
  0x59   : > { %p1749_p10 = pnand %p1748_p0, %p1744_p6 }
  0x5b   : > { %1752 = shalt.err (!%p1749_p10)
}
  0x5c   : > { %s1753_s8 = scalar_lea.vmem %s2032_s7, 2048  ;;  %s1851_s10 = smov [#allocation5]  }
  0x5d   : > { %p1754_p3 = scmp.ne.s32.totalorder %s2032_s7, %s1753_s8  ;;  %s1758_s12 = sshll.u32 %s1851_s10, 4  ;;  %s1759_s12 = int_to_ptr.vmem [resolvable:$false] %s1758_s12 }
  0x5e   : > { %s1760_s14 = scalar_lea.vmem %s1759_s12, 4096  ;;  %p1761_p13 = scmp.lt.s32.totalorder %s2032_s7, %s1759_s12 }
  0x5f   : > { %p1756_p11 = pnand %p1754_p3, %p1714_p7  ;;  %p1762_p1 = scmp.lt.s32.totalorder %s1760_s14, %s1753_s8 }
  0x61   : > { %p1757_p9 = pneg %p1756_p11  ;;  %p1763_p4 = por %p1762_p1, %p1761_p13 }
  0x63   : > { %p1764_p5 = pnand %p1763_p4, %p1757_p9 }
  0x65   : > { %1767 = shalt.err (!%p1764_p5)
}
  0x66   : > { %1499 = dma.hbm_to_vmem [thread:$0]  (!%p1990_p2), %s1997_s17, 2048, %s2032_s7, %s235_s16, %s2266_s11, %s2266_s11, %s2265_s9  }
  0x67   : > { %257 = sbr.rel (%p1925_p8) target bundleno = 440 (0x1b8), region = 40  ;;  %s2063_s0 = sand.u32 (!%p1925_p8), 1, %s1836_s19  }
  0x68   : > { %s1266_s30 = sshll.u32 (!%p1925_p8), %s2063_s0, 7  ;;  %s260_s28 = scalar_lea.sflag (!%p1925_p8), [#allocation3], %s2063_s0 }
  0x69   : > { %s2067_s2 = scalar_lea.vmem (!%p1925_p8), [#allocation2], %s1266_s30  ;;  %p2267_p7 = scmp.ne.s32.totalorder (!%p1925_p8), %s2257_s24, 0 }
  0x6c   : > { %1811 = dma.done.wait (%p2267_p7), %s260_s28, 2048  }
  0x6d   : > { %1813 = vsyncadd (%p2267_p7), %s260_s28, 4294965248  ;;  %s268_s13 = sand.u32 1, %s1906_s22   ;;  %s2074_s17 = scalar_lea.vmem [#allocation5], %s1266_s30 }
  0x6e   : > { %s269_s26 = scalar_lea.sflag [#allocation6], %s268_s13 }
  0x6f   : > { %1815 = dma.done.wait (%p2267_p7), %s269_s26, 2048  }
  0x70   : > { %1817 = vsyncadd (%p2267_p7), %s269_s26, 4294965248  ;;  %p2268_p8 = scmp.eq.s32.totalorder %s1906_s22, 0 }
  0x72   : > { %1819 = dma.done.wait (%p2268_p8), [#allocation6], 1024   ;;  %p2269_p2 = pmov %p2268_p8 }
  0x74   : > { %1821 = vsyncadd (%p2269_p2), [#allocation6], 4294966272  ;;  %p2270_p6 = pmov %p2269_p2 }
  0x75   : > { %p2271_p12 = pmov %p2269_p2 }
  0x76   : > { %1823 = dma.done.wait (%p2270_p6), [#allocation9], 1024  }
  0x77   : > { %1825 = vsyncadd (%p2271_p12), [#allocation9], 4294966272  ;;  %v1548_v0 = vld [vmem:[#allocation8 + $0x38] sm:$0xff]   ;;  %v1550_v2 = vld [vmem:[#allocation8 + $0x30] sm:$0xff]   ;;  %s1270_s9 = sshll.u32 %s2063_s0, 8  ;;  %s1327_s16 = sshll.u32 %s1906_s22, 12 }
  0x78   : > { %v1549_v1 = vld [vmem:[#allocation7 + $0x38] sm:$0xff]   ;;  %1376 = vmatprep.subr.bf16.mxu0 %v1548_v0  ;;  %v1551_v3 = vld [vmem:[#allocation7 + $0x30] sm:$0xff]   ;;  %v1552_v4 = vld [vmem:[#allocation8 + $0x28] sm:$0xff]   ;;  %s2134_s11 = scalar_lea.vmem [#allocation10], %s1270_s9  ;;  %s2195_s10 = scalar_lea.hbm %s2247_s5, %s1327_s16 }
  0x79   : > { %1424 = vmatprep.subr.bf16.mxu1 %v1549_v1  ;;  %1377 = vmatpush3.bf16.msra.mxu0 %v1548_v0  ;;  %v1553_v5 = vld [vmem:[#allocation7 + $0x28] sm:$0xff]   ;;  %v1554_v6 = vld [vmem:[#allocation8 + $0x20] sm:$0xff]   ;;  %v1556_v8 = vld [vmem:[#allocation8 + $0x18] sm:$0xff]   ;;  %s1139_s29 = sshll.u32 %s2134_s11, 4  ;;  %s1126_s12 = scalar_lea.sflag [#allocation4], %s2063_s0  ;;  %s2197_s29 = int_to_ptr.vmem [resolvable:$true] %s1139_s29 }
  0x7a   : > { %1425 = vmatpush3.bf16.msra.mxu1 %v1549_v1  ;;  %1378 = vmatprep.subr.bf16.mxu0 %v1550_v2  ;;  %v1555_v7 = vld [vmem:[#allocation7 + $0x20] sm:$0xff]   ;;  %v1557_v9 = vld [vmem:[#allocation7 + $0x18] sm:$0xff]   ;;  %v1558_v10 = vld [vmem:[#allocation8 + $0x10] sm:$0xff]   ;;  %s1768_s14 = scalar_lea.vmem %s2197_s29, 4096  ;;  %p2272_p10 = scmp.ne.s32.totalorder %s2262_s23, 0 }
  0x7b   : > { %1426 = vmatprep.subr.bf16.mxu1 %v1551_v3  ;;  %v1559_v11 = vld [vmem:[#allocation7 + $0x10] sm:$0xff]   ;;  %v1564_v12 = vld [vmem:[%s2074_s17] sm:$0xff]   ;;  %v1560_v14 = vld [vmem:[#allocation8 + $0x8] sm:$0xff]   ;;  %p1769_p0 = scmp.ne.s32.totalorder %s2197_s29, %s1768_s14  ;;  %s1852_s22 = smov [#allocation10]  }
  0x7c   : > { %v1565_v13 = vld [vmem:[%s2067_s2] sm:$0xff]   ;;  %1392 = vmatprep.mubr.bf16.mxu0 %v1564_v12  ;;  %v1561_v15 = vld [vmem:[#allocation7 + $0x8] sm:$0xff]   ;;  %v1568_v20 = vld [vmem:[%s2074_s17 + $0x10] sm:$0xff]   ;;  %s1772_s30 = sshll.u32 %s1852_s22, 4  ;;  %s1773_s30 = int_to_ptr.vmem [resolvable:$false] %s1772_s30 }
  0x7d   : > { %1379 = vmatpush3.bf16.msra.mxu0 %v1550_v2  ;;  %1440 = vmatprep.mubr.bf16.mxu1 %v1565_v13  ;;  %v1562_v16 = vld [vmem:[#allocation8] sm:$0xff]   ;;  %v1566_v18 = vld [vmem:[%s2074_s17 + $0x8] sm:$0xff]   ;;  %v1569_v21 = vld [vmem:[%s2067_s2 + $0x10] sm:$0xff]   ;;  %p1770_p3 = pnand %p1769_p0, %p2272_p10  ;;  %s1774_s28 = scalar_lea.vmem %s1773_s30, 8192 }
  0x7e   : > { %1427 = vmatpush3.bf16.msra.mxu1 %v1551_v3  ;;  %1380 = vmatprep.subr.bf16.mxu0 %v1552_v4  ;;  %v1563_v17 = vld [vmem:[#allocation7] sm:$0xff]   ;;  %v1567_v19 = vld [vmem:[%s2067_s2 + $0x8] sm:$0xff]   ;;  %v1570_v22 = vld [vmem:[%s2074_s17 + $0x18] sm:$0xff]   ;;  %p1775_p9 = scmp.lt.s32.totalorder %s2197_s29, %s1773_s30  ;;  %p1776_p13 = scmp.lt.s32.totalorder %s1774_s28, %s1768_s14 }
  0x7f   : > { %1428 = vmatprep.subr.bf16.mxu1 %v1553_v5  ;;  %v1571_v23 = vld [vmem:[%s2067_s2 + $0x18] sm:$0xff]   ;;  %v1572_v24 = vld [vmem:[%s2074_s17 + $0x20] sm:$0xff]   ;;  %v1574_v26 = vld [vmem:[%s2074_s17 + $0x28] sm:$0xff]   ;;  %p1771_p11 = pneg %p1770_p3 }
  0x80   : > { %v1573_v25 = vld [vmem:[%s2067_s2 + $0x20] sm:$0xff]   ;;  %v1575_v27 = vld [vmem:[%s2067_s2 + $0x28] sm:$0xff]   ;;  %v1576_v28 = vld [vmem:[%s2074_s17 + $0x30] sm:$0xff]   ;;  %p1777_p1 = por %p1776_p13, %p1775_p9 }
  0x81   : > { %1381 = vmatpush3.bf16.msra.mxu0 %v1552_v4  ;;  %v1577_v29 = vld [vmem:[%s2067_s2 + $0x30] sm:$0xff]   ;;  %v1578_v30 = vld [vmem:[%s2074_s17 + $0x38] sm:$0xff]   ;;  %v1580_v32 = vld [vmem:[%s2074_s17 + $0x40] sm:$0xff]  }
  0x82   : > { %1429 = vmatpush3.bf16.msra.mxu1 %v1553_v5  ;;  %1382 = vmatprep.subr.bf16.mxu0 %v1554_v6  ;;  %v1579_v31 = vld [vmem:[%s2067_s2 + $0x38] sm:$0xff]   ;;  %v1581_v33 = vld [vmem:[%s2067_s2 + $0x40] sm:$0xff]   ;;  %v1582_v34 = vld [vmem:[%s2074_s17 + $0x48] sm:$0xff]   ;;  %p1778_p4 = pnand %p1777_p1, %p1771_p11 }
  0x83   : > { %1430 = vmatprep.subr.bf16.mxu1 %v1555_v7  ;;  %v1583_v35 = vld [vmem:[%s2067_s2 + $0x48] sm:$0xff]   ;;  %v1584_v36 = vld [vmem:[%s2074_s17 + $0x50] sm:$0xff]   ;;  %v1586_v38 = vld [vmem:[%s2074_s17 + $0x58] sm:$0xff]  }
  0x84   : > { %v1585_v37 = vld [vmem:[%s2067_s2 + $0x50] sm:$0xff]   ;;  %v1587_v39 = vld [vmem:[%s2067_s2 + $0x58] sm:$0xff]   ;;  %v1588_v40 = vld [vmem:[%s2074_s17 + $0x60] sm:$0xff]  }
  0x85   : > { %1383 = vmatpush3.bf16.msra.mxu0 %v1554_v6  ;;  %v1589_v41 = vld [vmem:[%s2067_s2 + $0x60] sm:$0xff]   ;;  %v1590_v42 = vld [vmem:[%s2074_s17 + $0x68] sm:$0xff]   ;;  %v1592_v44 = vld [vmem:[%s2074_s17 + $0x70] sm:$0xff]  }
  0x86   : > { %1431 = vmatpush3.bf16.msra.mxu1 %v1555_v7  ;;  %1384 = vmatprep.subr.bf16.mxu0 %v1556_v8  ;;  %v1591_v43 = vld [vmem:[%s2067_s2 + $0x68] sm:$0xff]   ;;  %v1593_v45 = vld [vmem:[%s2067_s2 + $0x70] sm:$0xff]   ;;  %v1594_v46 = vld [vmem:[%s2074_s17 + $0x78] sm:$0xff]  }
  0x87   : > { %1432 = vmatprep.subr.bf16.mxu1 %v1557_v9  ;;  %v1595_v47 = vld [vmem:[%s2067_s2 + $0x78] sm:$0xff]   ;;  %v2123_v50 = vld [vmem:[%s2246_s4] ss:$0 sm:$0xff] }
  0x89   : > { %1385 = vmatpush3.bf16.msra.mxu0 %v1556_v8 }
  0x8a   : > { %1433 = vmatpush3.bf16.msra.mxu1 %v1557_v9  ;;  %1386 = vmatprep.subr.bf16.mxu0 %v1558_v10 }
  0x8b   : > { %1434 = vmatprep.subr.bf16.mxu1 %v1559_v11 }
  0x8d   : > { %1387 = vmatpush3.bf16.msra.mxu0 %v1558_v10 }
  0x8e   : > { %1435 = vmatpush3.bf16.msra.mxu1 %v1559_v11  ;;  %1388 = vmatprep.subr.bf16.mxu0 %v1560_v14 }
  0x8f   : > { %1436 = vmatprep.subr.bf16.mxu1 %v1561_v15 }
  0x91   : > { %1389 = vmatpush3.bf16.msra.mxu0 %v1560_v14 }
  0x92   : > { %1437 = vmatpush3.bf16.msra.mxu1 %v1561_v15  ;;  %1390 = vmatprep.subr.bf16.mxu0 %v1562_v16 }
  0x93   : > { %1438 = vmatprep.subr.bf16.mxu1 %v1563_v17 }
  0x95   : > { %1391 = vmatpush3.bf16.msra.mxu0 %v1562_v16 }
  0x96   : > { %1439 = vmatpush3.bf16.msra.mxu1 %v1563_v17 }
  0x98   : > { %1393 = vmatmul.mubr.bf16.vlgmr.msra.gmra.mxu0 %v1566_v18 }
  0x99   : > { %1441 = vmatmul.mubr.bf16.vlgmr.msra.gmra.mxu1 %v1567_v19  ;;  %1396 = vmatprep.mubr.bf16.mxu0 %v1568_v20 }
  0x9a   : > { %1444 = vmatprep.mubr.bf16.mxu1 %v1569_v21 }
  0xa0   : > { %1397 = vmatmul.mubr.bf16.gmra.mxu0 %v1570_v22 }
  0xa1   : > { %1445 = vmatmul.mubr.bf16.gmra.mxu1 %v1571_v23  ;;  %1400 = vmatprep.mubr.bf16.mxu0 %v1572_v24 }
  0xa2   : > { %1448 = vmatprep.mubr.bf16.mxu1 %v1573_v25 }
  0xa8   : > { %1401 = vmatmul.mubr.bf16.gmra.mxu0 %v1574_v26 }
  0xa9   : > { %1449 = vmatmul.mubr.bf16.gmra.mxu1 %v1575_v27  ;;  %1404 = vmatprep.mubr.bf16.mxu0 %v1576_v28 }
  0xaa   : > { %1452 = vmatprep.mubr.bf16.mxu1 %v1577_v29 }
  0xb0   : > { %1405 = vmatmul.mubr.bf16.gmra.mxu0 %v1578_v30 }
  0xb1   : > { %1453 = vmatmul.mubr.bf16.gmra.mxu1 %v1579_v31  ;;  %1408 = vmatprep.mubr.bf16.mxu0 %v1580_v32 }
  0xb2   : > { %1456 = vmatprep.mubr.bf16.mxu1 %v1581_v33 }
  0xb8   : > { %1409 = vmatmul.mubr.bf16.gmra.mxu0 %v1582_v34 }
  0xb9   : > { %1457 = vmatmul.mubr.bf16.gmra.mxu1 %v1583_v35  ;;  %1412 = vmatprep.mubr.bf16.mxu0 %v1584_v36 }
  0xba   : > { %1460 = vmatprep.mubr.bf16.mxu1 %v1585_v37 }
  0xc0   : > { %1413 = vmatmul.mubr.bf16.gmra.mxu0 %v1586_v38 }
  0xc1   : > { %1461 = vmatmul.mubr.bf16.gmra.mxu1 %v1587_v39  ;;  %1416 = vmatprep.mubr.bf16.mxu0 %v1588_v40 }
  0xc2   : > { %1464 = vmatprep.mubr.bf16.mxu1 %v1589_v41 }
  0xc8   : > { %1417 = vmatmul.mubr.bf16.gmra.mxu0 %v1590_v42 }
  0xc9   : > { %1465 = vmatmul.mubr.bf16.gmra.mxu1 %v1591_v43  ;;  %1420 = vmatprep.mubr.bf16.mxu0 %v1592_v44 }
  0xca   : > { %1468 = vmatprep.mubr.bf16.mxu1 %v1593_v45 }
  0xd0   : > { %1421 = vmatmul.mubr.bf16.gmra.mxu0 %v1594_v46 }
  0xd1   : > { %1469 = vmatmul.mubr.bf16.gmra.mxu1 %v1595_v47 }
 0x158   : > { %v1394_v48 = vpop.f32.mrf.mxu0 }
 0x159   : > { %v1442_v49 = vpop.f32.mrf.mxu1 }
 0x15a   : > { %v904_v51 = vadd.f32 %v1442_v49, %v1394_v48  ;;  %v590_v52 = vpop.f32.mrf.mxu0 }
 0x15b   : > { %v895_v53 = vpop.f32.mrf.mxu1 }
 0x15c   : > { %v1031_v54 = vadd.f32 %v2123_v50, %v904_v51  ;;  %v896_v55 = vadd.f32 %v895_v53, %v590_v52  ;;  %v1395_v56 = vpop.f32.mrf.mxu0 }
 0x15d   : > { %v1443_v57 = vpop.f32.mrf.mxu1 }
 0x15e   : > { %1596 = vtanh.f32 %v1031_v54  ;;  %v1029_v58 = vadd.f32 %v2123_v50, %v896_v55  ;;  %v907_v59 = vadd.f32 %v1443_v57, %v1395_v56  ;;  %v593_v60 = vpop.f32.mrf.mxu0 }
 0x15f   : > { %v898_v61 = vpop.f32.mrf.mxu1 }
 0x160   : > { %1598 = vtanh.f32 %v1029_v58  ;;  %v1032_v62 = vadd.f32 %v2123_v50, %v907_v59  ;;  %v899_v63 = vadd.f32 %v898_v61, %v593_v60  ;;  %v1398_v0 = vpop.f32.mrf.mxu0 }
 0x161   : > { %v1446_v1 = vpop.f32.mrf.mxu1 }
 0x162   : > { %1600 = vtanh.f32 %v1032_v62  ;;  %v1030_v2 = vadd.f32 %v2123_v50, %v899_v63  ;;  %v920_v3 = vadd.f32 %v1446_v1, %v1398_v0  ;;  %v606_v4 = vpop.f32.mrf.mxu0 }
 0x163   : > { %v911_v5 = vpop.f32.mrf.mxu1 }
 0x164   : > { %1602 = vtanh.f32 %v1030_v2  ;;  %v1035_v6 = vadd.f32 %v2123_v50, %v920_v3  ;;  %v912_v7 = vadd.f32 %v911_v5, %v606_v4  ;;  %v1399_v8 = vpop.f32.mrf.mxu0 }
 0x165   : > { %v1447_v9 = vpop.f32.mrf.mxu1 }
 0x166   : > { %1604 = vtanh.f32 %v1035_v6  ;;  %v1033_v10 = vadd.f32 %v2123_v50, %v912_v7  ;;  %v923_v11 = vadd.f32 %v1447_v9, %v1399_v8  ;;  %v609_v12 = vpop.f32.mrf.mxu0 }
 0x167   : > { %v914_v13 = vpop.f32.mrf.mxu1 }
 0x168   : > { %1606 = vtanh.f32 %v1033_v10  ;;  %v1036_v14 = vadd.f32 %v2123_v50, %v923_v11  ;;  %v915_v15 = vadd.f32 %v914_v13, %v609_v12  ;;  %v1402_v16 = vpop.f32.mrf.mxu0 }
 0x169   : > { %v1450_v17 = vpop.f32.mrf.mxu1 }
 0x16a   : > { %1608 = vtanh.f32 %v1036_v14  ;;  %v1034_v18 = vadd.f32 %v2123_v50, %v915_v15  ;;  %v936_v19 = vadd.f32 %v1450_v17, %v1402_v16  ;;  %v622_v20 = vpop.f32.mrf.mxu0 }
 0x16b   : > { %v1597_v21 = vpop.eup %1596  ;;  %v927_v22 = vpop.f32.mrf.mxu1 }
 0x16c   : > { %1095 = vst [vmem:[%s2134_s11 + $0x10] sm:$0xff] %v1597_v21  ;;  %1610 = vtanh.f32 %v1034_v18  ;;  %v1039_v23 = vadd.f32 %v2123_v50, %v936_v19  ;;  %v928_v24 = vadd.f32 %v927_v22, %v622_v20  ;;  %v1403_v25 = vpop.f32.mrf.mxu0 }
 0x16d   : > { %v1599_v26 = vpop.eup %1598  ;;  %v1451_v27 = vpop.f32.mrf.mxu1 }
 0x16e   : > { %1093 = vst [vmem:[%s2134_s11] sm:$0xff] %v1599_v26  ;;  %1612 = vtanh.f32 %v1039_v23  ;;  %v1037_v28 = vadd.f32 %v2123_v50, %v928_v24  ;;  %v939_v29 = vadd.f32 %v1451_v27, %v1403_v25  ;;  %v625_v30 = vpop.f32.mrf.mxu0 }
 0x16f   : > { %v1601_v31 = vpop.eup %1600  ;;  %v930_v32 = vpop.f32.mrf.mxu1 }
 0x170   : > { %1096 = vst [vmem:[%s2134_s11 + $0x18] sm:$0xff] %v1601_v31  ;;  %1614 = vtanh.f32 %v1037_v28  ;;  %v1040_v33 = vadd.f32 %v2123_v50, %v939_v29  ;;  %v931_v34 = vadd.f32 %v930_v32, %v625_v30  ;;  %v1406_v35 = vpop.f32.mrf.mxu0 }
 0x171   : > { %v1603_v36 = vpop.eup %1602  ;;  %v1454_v37 = vpop.f32.mrf.mxu1 }
 0x172   : > { %1094 = vst [vmem:[%s2134_s11 + $0x8] sm:$0xff] %v1603_v36  ;;  %1616 = vtanh.f32 %v1040_v33  ;;  %v1038_v38 = vadd.f32 %v2123_v50, %v931_v34  ;;  %v952_v39 = vadd.f32 %v1454_v37, %v1406_v35  ;;  %v638_v40 = vpop.f32.mrf.mxu0 }
 0x173   : > { %v1605_v41 = vpop.eup %1604  ;;  %v943_v42 = vpop.f32.mrf.mxu1 }
 0x174   : > { %1099 = vst [vmem:[%s2134_s11 + $0x30] sm:$0xff] %v1605_v41  ;;  %1618 = vtanh.f32 %v1038_v38  ;;  %v1043_v43 = vadd.f32 %v2123_v50, %v952_v39  ;;  %v944_v44 = vadd.f32 %v943_v42, %v638_v40  ;;  %v1407_v45 = vpop.f32.mrf.mxu0 }
 0x175   : > { %v1607_v46 = vpop.eup %1606  ;;  %v1455_v47 = vpop.f32.mrf.mxu1 }
 0x176   : > { %1097 = vst [vmem:[%s2134_s11 + $0x20] sm:$0xff] %v1607_v46  ;;  %1620 = vtanh.f32 %v1043_v43  ;;  %v1041_v48 = vadd.f32 %v2123_v50, %v944_v44  ;;  %v955_v49 = vadd.f32 %v1455_v47, %v1407_v45  ;;  %v641_v51 = vpop.f32.mrf.mxu0 }
 0x177   : > { %v1609_v52 = vpop.eup %1608  ;;  %v946_v53 = vpop.f32.mrf.mxu1 }
 0x178   : > { %1100 = vst [vmem:[%s2134_s11 + $0x38] sm:$0xff] %v1609_v52  ;;  %1622 = vtanh.f32 %v1041_v48  ;;  %v1044_v54 = vadd.f32 %v2123_v50, %v955_v49  ;;  %v947_v55 = vadd.f32 %v946_v53, %v641_v51  ;;  %v1410_v56 = vpop.f32.mrf.mxu0 }
 0x179   : > { %v1611_v57 = vpop.eup %1610  ;;  %v1458_v58 = vpop.f32.mrf.mxu1 }
 0x17a   : > { %1098 = vst [vmem:[%s2134_s11 + $0x28] sm:$0xff] %v1611_v57  ;;  %1624 = vtanh.f32 %v1044_v54  ;;  %v1042_v59 = vadd.f32 %v2123_v50, %v947_v55  ;;  %v968_v60 = vadd.f32 %v1458_v58, %v1410_v56  ;;  %v654_v61 = vpop.f32.mrf.mxu0 }
 0x17b   : > { %v1613_v62 = vpop.eup %1612  ;;  %v959_v63 = vpop.f32.mrf.mxu1 }
 0x17c   : > { %1103 = vst [vmem:[%s2134_s11 + $0x50] sm:$0xff] %v1613_v62  ;;  %1626 = vtanh.f32 %v1042_v59  ;;  %v1047_v0 = vadd.f32 %v2123_v50, %v968_v60  ;;  %v960_v1 = vadd.f32 %v959_v63, %v654_v61  ;;  %v1411_v2 = vpop.f32.mrf.mxu0 }
 0x17d   : > { %v1615_v3 = vpop.eup %1614  ;;  %v1459_v4 = vpop.f32.mrf.mxu1 }
 0x17e   : > { %1101 = vst [vmem:[%s2134_s11 + $0x40] sm:$0xff] %v1615_v3  ;;  %1628 = vtanh.f32 %v1047_v0  ;;  %v1045_v5 = vadd.f32 %v2123_v50, %v960_v1  ;;  %v971_v6 = vadd.f32 %v1459_v4, %v1411_v2  ;;  %v657_v7 = vpop.f32.mrf.mxu0 }
 0x17f   : > { %v1617_v8 = vpop.eup %1616  ;;  %v962_v9 = vpop.f32.mrf.mxu1 }
 0x180   : > { %1104 = vst [vmem:[%s2134_s11 + $0x58] sm:$0xff] %v1617_v8  ;;  %1630 = vtanh.f32 %v1045_v5  ;;  %v1048_v10 = vadd.f32 %v2123_v50, %v971_v6  ;;  %v963_v11 = vadd.f32 %v962_v9, %v657_v7  ;;  %v1414_v12 = vpop.f32.mrf.mxu0 }
 0x181   : > { %v1619_v13 = vpop.eup %1618  ;;  %v1462_v14 = vpop.f32.mrf.mxu1 }
 0x182   : > { %1102 = vst [vmem:[%s2134_s11 + $0x48] sm:$0xff] %v1619_v13  ;;  %1632 = vtanh.f32 %v1048_v10  ;;  %v1046_v15 = vadd.f32 %v2123_v50, %v963_v11  ;;  %v984_v16 = vadd.f32 %v1462_v14, %v1414_v12  ;;  %v670_v17 = vpop.f32.mrf.mxu0 }
 0x183   : > { %v1621_v18 = vpop.eup %1620  ;;  %v975_v19 = vpop.f32.mrf.mxu1 }
 0x184   : > { %1107 = vst [vmem:[%s2134_s11 + $0x70] sm:$0xff] %v1621_v18  ;;  %1634 = vtanh.f32 %v1046_v15  ;;  %v1051_v20 = vadd.f32 %v2123_v50, %v984_v16  ;;  %v976_v21 = vadd.f32 %v975_v19, %v670_v17  ;;  %v1415_v22 = vpop.f32.mrf.mxu0 }
 0x185   : > { %v1623_v23 = vpop.eup %1622  ;;  %v1463_v24 = vpop.f32.mrf.mxu1 }
 0x186   : > { %1105 = vst [vmem:[%s2134_s11 + $0x60] sm:$0xff] %v1623_v23  ;;  %1636 = vtanh.f32 %v1051_v20  ;;  %v1049_v25 = vadd.f32 %v2123_v50, %v976_v21  ;;  %v987_v26 = vadd.f32 %v1463_v24, %v1415_v22  ;;  %v673_v27 = vpop.f32.mrf.mxu0 }
 0x187   : > { %v1625_v28 = vpop.eup %1624  ;;  %v978_v29 = vpop.f32.mrf.mxu1 }
 0x188   : > { %1108 = vst [vmem:[%s2134_s11 + $0x78] sm:$0xff] %v1625_v28  ;;  %1638 = vtanh.f32 %v1049_v25  ;;  %v1052_v30 = vadd.f32 %v2123_v50, %v987_v26  ;;  %v979_v31 = vadd.f32 %v978_v29, %v673_v27  ;;  %v1418_v32 = vpop.f32.mrf.mxu0 }
 0x189   : > { %v1627_v33 = vpop.eup %1626  ;;  %v1466_v34 = vpop.f32.mrf.mxu1 }
 0x18a   : > { %1106 = vst [vmem:[%s2134_s11 + $0x68] sm:$0xff] %v1627_v33  ;;  %1640 = vtanh.f32 %v1052_v30  ;;  %v1050_v35 = vadd.f32 %v2123_v50, %v979_v31  ;;  %v1000_v36 = vadd.f32 %v1466_v34, %v1418_v32  ;;  %v686_v37 = vpop.f32.mrf.mxu0 }
 0x18b   : > { %v1629_v38 = vpop.eup %1628  ;;  %v991_v39 = vpop.f32.mrf.mxu1 }
 0x18c   : > { %1111 = vst [vmem:[%s2134_s11 + $0x90] sm:$0xff] %v1629_v38  ;;  %1642 = vtanh.f32 %v1050_v35  ;;  %v1055_v40 = vadd.f32 %v2123_v50, %v1000_v36  ;;  %v992_v41 = vadd.f32 %v991_v39, %v686_v37  ;;  %v1419_v42 = vpop.f32.mrf.mxu0 }
 0x18d   : > { %v1631_v43 = vpop.eup %1630  ;;  %v1467_v44 = vpop.f32.mrf.mxu1 }
 0x18e   : > { %1109 = vst [vmem:[%s2134_s11 + $0x80] sm:$0xff] %v1631_v43  ;;  %1644 = vtanh.f32 %v1055_v40  ;;  %v1053_v45 = vadd.f32 %v2123_v50, %v992_v41  ;;  %v1003_v46 = vadd.f32 %v1467_v44, %v1419_v42  ;;  %v689_v47 = vpop.f32.mrf.mxu0 }
 0x18f   : > { %v1633_v48 = vpop.eup %1632  ;;  %v994_v49 = vpop.f32.mrf.mxu1 }
 0x190   : > { %1112 = vst [vmem:[%s2134_s11 + $0x98] sm:$0xff] %v1633_v48  ;;  %1646 = vtanh.f32 %v1053_v45  ;;  %v1056_v51 = vadd.f32 %v2123_v50, %v1003_v46  ;;  %v995_v52 = vadd.f32 %v994_v49, %v689_v47  ;;  %v1422_v53 = vpop.f32.mrf.mxu0 }
 0x191   : > { %v1635_v54 = vpop.eup %1634  ;;  %v1470_v55 = vpop.f32.mrf.mxu1 }
 0x192   : > { %1110 = vst [vmem:[%s2134_s11 + $0x88] sm:$0xff] %v1635_v54  ;;  %1648 = vtanh.f32 %v1056_v51  ;;  %v1054_v56 = vadd.f32 %v2123_v50, %v995_v52  ;;  %v1016_v57 = vadd.f32 %v1470_v55, %v1422_v53  ;;  %v702_v58 = vpop.f32.mrf.mxu0 }
 0x193   : > { %v1637_v59 = vpop.eup %1636  ;;  %v1007_v60 = vpop.f32.mrf.mxu1 }
 0x194   : > { %1115 = vst [vmem:[%s2134_s11 + $0xb0] sm:$0xff] %v1637_v59  ;;  %1650 = vtanh.f32 %v1054_v56  ;;  %v1059_v61 = vadd.f32 %v2123_v50, %v1016_v57  ;;  %v1008_v62 = vadd.f32 %v1007_v60, %v702_v58  ;;  %v1423_v63 = vpop.f32.mrf.mxu0 }
 0x195   : > { %v1639_v0 = vpop.eup %1638  ;;  %v1471_v1 = vpop.f32.mrf.mxu1 }
 0x196   : > { %1113 = vst [vmem:[%s2134_s11 + $0xa0] sm:$0xff] %v1639_v0  ;;  %1652 = vtanh.f32 %v1059_v61  ;;  %v1057_v2 = vadd.f32 %v2123_v50, %v1008_v62  ;;  %v1019_v3 = vadd.f32 %v1471_v1, %v1423_v63  ;;  %v705_v4 = vpop.f32.mrf.mxu0 }
 0x197   : > { %v1641_v5 = vpop.eup %1640  ;;  %v1010_v6 = vpop.f32.mrf.mxu1 }
 0x198   : > { %1116 = vst [vmem:[%s2134_s11 + $0xb8] sm:$0xff] %v1641_v5  ;;  %1654 = vtanh.f32 %v1057_v2  ;;  %v1060_v7 = vadd.f32 %v2123_v50, %v1019_v3  ;;  %v1011_v8 = vadd.f32 %v1010_v6, %v705_v4 }
 0x199   : > { %v1643_v9 = vpop.eup %1642 }
 0x19a   : > { %1114 = vst [vmem:[%s2134_s11 + $0xa8] sm:$0xff] %v1643_v9  ;;  %1656 = vtanh.f32 %v1060_v7  ;;  %v1058_v10 = vadd.f32 %v2123_v50, %v1011_v8 }
 0x19b   : > { %v1645_v11 = vpop.eup %1644 }
 0x19c   : > { %1119 = vst [vmem:[%s2134_s11 + $0xd0] sm:$0xff] %v1645_v11  ;;  %1658 = vtanh.f32 %v1058_v10 }
 0x19d   : > { %v1647_v12 = vpop.eup %1646 }
 0x19e   : > { %1117 = vst [vmem:[%s2134_s11 + $0xc0] sm:$0xff] %v1647_v12 }
 0x19f   : > { %v1649_v13 = vpop.eup %1648 }
 0x1a0   : > { %1120 = vst [vmem:[%s2134_s11 + $0xd8] sm:$0xff] %v1649_v13 }
 0x1a1   : > { %v1651_v14 = vpop.eup %1650 }
 0x1a2   : > { %1118 = vst [vmem:[%s2134_s11 + $0xc8] sm:$0xff] %v1651_v14 }
 0x1a3   : > { %v1653_v15 = vpop.eup %1652 }
 0x1a4   : > { %1123 = vst [vmem:[%s2134_s11 + $0xf0] sm:$0xff] %v1653_v15 }
 0x1a5   : > { %v1655_v16 = vpop.eup %1654 }
 0x1a6   : > { %1121 = vst [vmem:[%s2134_s11 + $0xe0] sm:$0xff] %v1655_v16 }
 0x1a7   : > { %v1657_v50 = vpop.eup %1656 }
 0x1a8   : > { %1124 = vst [vmem:[%s2134_s11 + $0xf8] sm:$0xff] %v1657_v50 }
 0x1a9   : > { %v1659_v17 = vpop.eup %1658 }
 0x1aa   : > { %1122 = vst [vmem:[%s2134_s11 + $0xe8] sm:$0xff] %v1659_v17 }
 0x1ab   : > { %1781 = shalt.err (!%p1778_p4)
}
 0x1ac   : > { %s1782_s2 = scalar_lea.hbm %s2195_s10, 4096  ;;  %s1786_s17 = scalar_lea.hbm %s2247_s5, 8192 }
 0x1ad   : > { %p1783_p5 = scmp.ne.s32.totalorder %s2195_s10, %s1782_s2  ;;  %p1787_p2 = scmp.lt.s32.totalorder %s2195_s10, %s2247_s5 }
 0x1ae   : > { %p1788_p6 = scmp.lt.s32.totalorder %s1786_s17, %s1782_s2 }
 0x1af   : > { %p1784_p7 = pnand %p1783_p5, %p2272_p10 }
 0x1b0   : > { %p1789_p12 = por %p1788_p6, %p1787_p2 }
 0x1b1   : > { %p1785_p8 = pneg %p1784_p7 }
 0x1b3   : > { %p1790_p0 = pnand %p1789_p12, %p1785_p8 }
 0x1b5   : > { %1793 = shalt.err (!%p1790_p0)
}
 0x1b6   : > { %s1853_s9 = smov 128   ;;  %s1854_s11 = smov 8  }
 0x1b7   : > { %1484 = dma.vmem_to_hbm [thread:$0]  (%p2272_p10), %s2197_s29, 4096, %s2195_s10, %s1126_s12, %s1853_s9, %s1853_s9, %s1854_s11  }
 0x1b8 PF: > { %s1154_s16 = sand.u32 1, %s1832_s18   ;;  %p2273_p3 = scmp.ne.s32.totalorder %s2258_s25, 0 }
 0x1b9   : > { %p2274_p11 = scmp.ge.s32.totalorder %s1844_s21, 2  ;;  %s1155_s6 = scalar_lea.sflag [#allocation4], %s1154_s16 }
 0x1bb   : > { %p1501_p9 = pnand %p2274_p11, %p2273_p3 }
 0x1bd   : > { %p1502_p13 = pneg %p1501_p9 }
 0x1bf   : > { %1827 = dma.done.wait (%p1502_p13), %s1155_s6, 4096  }
 0x1c0   : > { %1829 = vsyncadd (%p1502_p13), %s1155_s6, 4294963200  ;;  %p22_p1 = scmp.ge.s32.totalorder %s1963_s15, 4   ;;  %s2275_s18 = smov %s1836_s19 }
 0x1c1   : > { %s2276_s19 = smov %s1840_s20  ;;  %s2277_s20 = smov %s1979_s27 }
 0x1c2   : > { %s2278_s21 = smov %s1963_s15  ;;  %24 = sbr.rel (!%p22_p1) target bundleno = 11 (0xb), region = 106 }
 0x1c7   :  { %1160 = vsyncpa [#allocation3], 1 }
 0x1c8   :  { %1162 = vsyncpa [#allocation3 + $0x1], 1 }
 0x1c9   :  { %1163 = vsyncpa [#allocation6], 1 }
 0x1ca   :  { %1165 = vsyncpa [#allocation6 + $0x1], 1 }
 0x1cb   :  { %1166 = vsyncpa [#allocation9], 1 }
 0x1cc   :  { %1167 = vsyncpa [#allocation4], 1 }
 0x1cd   :  { %1169 = vsyncpa [#allocation4 + $0x1], 1 }

</bundles_post_ra>
